<compile_context>
chip_gen: v5e
topology: v5e:2x2
jax: 0.10.0
libtpu: 0.0.40
codegen_flags: <defaults>
</compile_context>

<pallas_src>
import math

import jax
import jax.numpy as jnp
from jax import lax
from jax.experimental import pallas as pl
from jax.experimental.pallas import tpu as pltpu

_EPS = 1e-5
_INV_SQRT2 = 1.0 / math.sqrt(2.0)
_LANE = 128


def _round_up(x, m):
    return ((x + m - 1) // m) * m


def _gelu_exact(x):
    # PyTorch nn.GELU default (erf-based). Kept exact to preserve module semantics.
    return 0.5 * x * (1.0 + lax.erf(x * _INV_SQRT2))


def _make_mlp_kernel(n_hidden):
    """Fused kernel: n_hidden x [Linear(+folded BN) -> GELU] followed by a final Linear."""

    def kernel(*refs):
        # refs layout:
        #   refs[0]                  : x tile       (TB, D_in)          f32
        #   per layer (2 refs)       : W (in, out)  bf16, b (1, out) f32  (BN already folded in)
        #   refs[-1]                 : out tile     (TB, D_out_padded)  f32
        x_ref = refs[0]
        out_ref = refs[-1]

        h = x_ref[...].astype(jnp.float32)
        idx = 1
        for _ in range(n_hidden):
            w, b = refs[idx], refs[idx + 1]
            idx += 2
            # bf16 MXU inputs, f32 accumulation; bias + GELU in f32 on the VPU/EUP.
            h = jnp.dot(h.astype(jnp.bfloat16), w[...],
                        preferred_element_type=jnp.float32) + b[...]
            h = _gelu_exact(h)
            # Dropout: identity in eval mode.
        wo, bo = refs[idx], refs[idx + 1]
        out_ref[...] = (jnp.dot(h.astype(jnp.bfloat16), wo[...],
                                preferred_element_type=jnp.float32)
                        + bo[...]).astype(out_ref.dtype)

    return kernel


class FlexibleCompensatorPallas:
    """JAX/Pallas port of the PyTorch FlexibleCompensator (eval mode)."""

    def __init__(self, input_dim, hidden_sizes, output_dim=None, key=None):
        if output_dim is None:
            output_dim = input_dim
        if key is None:
            key = jax.random.PRNGKey(0)
        self.input_dim = int(input_dim)
        self.hidden_sizes = [int(h) for h in hidden_sizes]
        self.output_dim = int(output_dim)

        # ------------------------------------------------------------------
        # Raw (PyTorch-layout-equivalent) parameters. Linear: U(-1/sqrt(in), 1/sqrt(in)).
        # BN stats here are deliberately non-trivial to exercise the folding; in
        # practice they come from a trained checkpoint (PyTorch defaults are
        # gamma=1, beta=0, mean=0, var=1).
        # ------------------------------------------------------------------
        raw_hidden = []
        prev = self.input_dim
        for h in self.hidden_sizes:
            key, kw, kb, kg, kbe, km, kv = jax.random.split(key, 7)
            bound = 1.0 / math.sqrt(prev)
            W = jax.random.uniform(kw, (prev, h), jnp.float32, -bound, bound)   # (in, out) = W^T
            b = jax.random.uniform(kb, (h,), jnp.float32, -bound, bound)
            gamma = 1.0 + 0.1 * jax.random.normal(kg, (h,), jnp.float32)
            beta = 0.1 * jax.random.normal(kbe, (h,), jnp.float32)
            rmean = 0.1 * jax.random.normal(km, (h,), jnp.float32)
            rvar = 1.0 + 0.1 * jnp.abs(jax.random.normal(kv, (h,), jnp.float32))
            raw_hidden.append((W, b, gamma, beta, rmean, rvar))
            prev = h
        key, kw, kb = jax.random.split(key, 3)
        bound = 1.0 / math.sqrt(prev)
        Wo = jax.random.uniform(kw, (prev, self.output_dim), jnp.float32, -bound, bound)
        bo = jax.random.uniform(kb, (self.output_dim,), jnp.float32, -bound, bound)
        self.raw_hidden = raw_hidden
        self.raw_out = (Wo, bo)

        # ------------------------------------------------------------------
        # Fold BN into Linear, zero-pad feature dims to multiples of 128 lanes,
        # and store weights in bf16 (biases stay f32).
        # Padding is exact: padded bias columns are 0 -> GELU(0)=0 -> padded
        # input rows of the next weight are 0 -> no contribution.
        # ------------------------------------------------------------------
        fused = []
        padded_dims = [self.input_dim]           # input dim is NOT padded (x passed as-is)
        prev_pad = self.input_dim
        prev = self.input_dim
        for (W, b, g, be, m, v) in raw_hidden:
            scale = g * lax.rsqrt(v + _EPS)
            Wf = W * scale[None, :]
            bf = (b - m) * scale + be
            h = W.shape[1]
            h_pad = _round_up(h, _LANE)
            Wp = jnp.zeros((prev_pad, h_pad), jnp.float32).at[:prev, :h].set(Wf)
            bp = jnp.zeros((1, h_pad), jnp.float32).at[0, :h].set(bf)
            fused.extend([Wp.astype(jnp.bfloat16), bp])
            padded_dims.append(h_pad)
            prev, prev_pad = h, h_pad
        out_pad = _round_up(self.output_dim, _LANE)
        Wop = jnp.zeros((prev_pad, out_pad), jnp.float32).at[:prev, :self.output_dim].set(Wo)
        bop = jnp.zeros((1, out_pad), jnp.float32).at[0, :self.output_dim].set(bo)
        fused.extend([Wop.astype(jnp.bfloat16), bop])
        padded_dims.append(out_pad)

        self.fused_params = fused
        self.out_pad = out_pad
        self._padded_dims = padded_dims
        self._kernel = _make_mlp_kernel(len(self.hidden_sizes))

    # ----------------------------------------------------------------------
    def _pick_batch_tile(self, B):
        """Pick a batch tile that fits a conservative VMEM budget (v7x-safe)."""
        weight_bytes = sum(int(p.size) * p.dtype.itemsize for p in self.fused_params)
        d_in, d_out = self._padded_dims[0], self._padded_dims[-1]
        max_feat = max(self._padded_dims)
        # double-buffered x/out tiles (f32) + ~2 activation slabs of the widest layer (f32)
        per_row_bytes = 2 * 4 * (d_in + d_out) + 2 * 4 * max_feat
        budget = 24 * 1024 * 1024                     # stay under the 32 MiB scoped default
        avail = max(budget - weight_bytes, 8 * per_row_bytes)
        tb = min(512, _round_up(B, 8), max(8, (avail // per_row_bytes) // 8 * 8))
        vmem_needed = weight_bytes + tb * per_row_bytes
        return int(tb), int(weight_bytes), int(vmem_needed)

    def __call__(self, x):
        B, D = x.shape
        assert D == self.input_dim, (D, self.input_dim)
        out_pad = self.out_pad
        tb, weight_bytes, vmem_needed = self._pick_batch_tile(B)
        grid = (pl.cdiv(B, tb),)

        # x / out are tiled along batch; weights have constant index_maps so they
        # stay VMEM-resident across batch tiles (fetched once, not per tile).
        in_specs = [pl.BlockSpec((tb, self.input_dim), lambda i: (i, 0))]
        for p in self.fused_params:
            in_specs.append(pl.BlockSpec(p.shape, lambda i: (0, 0)))
        out_specs = pl.BlockSpec((tb, out_pad), lambda i: (i, 0))

        dims = self._padded_dims
        flops = 2 * B * sum(dims[i] * dims[i + 1] for i in range(len(dims) - 1))
        transcendentals = B * sum(dims[1:-1])         # one erf per hidden activation
        bytes_accessed = int(x.size) * 4 + B * out_pad * 4 + weight_bytes
        cost = pl.CostEstimate(flops=int(flops),
                               transcendentals=int(transcendentals),
                               bytes_accessed=int(bytes_accessed))

        cp_kwargs = dict(dimension_semantics=("parallel",))   # shards batch tiles across TCs (v7x)
        if vmem_needed > 30 * 1024 * 1024:
            cp_kwargs["vmem_limit_bytes"] = int(min(vmem_needed + (4 << 20), 120 * 1024 * 1024))

        out = pl.pallas_call(
            self._kernel,
            out_shape=jax.ShapeDtypeStruct((B, out_pad), jnp.float32),
            grid=grid,
            in_specs=in_specs,
            out_specs=out_specs,
            compiler_params=pltpu.CompilerParams(**cp_kwargs),
            cost_estimate=cost,
        )(x, *self.fused_params)

        # Drop lane padding (no-op if output_dim is already a multiple of 128).
        return out[:, :self.output_dim]


# --------------------------------------------------------------------------
# Pure-JAX references (for sanity checks)
# --------------------------------------------------------------------------
def _reference_exact(model: FlexibleCompensatorPallas, x):
    """Exact f32, unfolded BN — matches the PyTorch eval-mode forward."""
    h = x.astype(jnp.float32)
    for (W, b, g, be, m, v) in model.raw_hidden:
        h = h @ W + b
        h = (h - m) * lax.rsqrt(v + _EPS) * g + be
        h = _gelu_exact(h)
        # dropout: identity in eval mode
    Wo, bo = model.raw_out
    return h @ Wo + bo


def _reference_fused(model: FlexibleCompensatorPallas, x):
    """Same math as the kernel (folded BN, bf16 matmul inputs, f32 accumulation)."""
    h = x.astype(jnp.float32)
    p = model.fused_params
    n = len(model.hidden_sizes)
    for l in range(n):
        W, b = p[2 * l], p[2 * l + 1]
        h = jnp.dot(h.astype(jnp.bfloat16), W, preferred_element_type=jnp.float32) + b
        h = _gelu_exact(h)
    Wo, bo = p[2 * n], p[2 * n + 1]
    out = jnp.dot(h.astype(jnp.bfloat16), Wo, preferred_element_type=jnp.float32) + bo
    return out[:, :model.output_dim]


if __name__ == "__main__":
    key = jax.random.PRNGKey(0)
    kx, kp = jax.random.split(key)

    B, D_in = 8, 32
    hidden_sizes = [64, 64]

    model = FlexibleCompensatorPallas(D_in, hidden_sizes, output_dim=None, key=kp)
    x = jax.random.normal(kx, (B, D_in), jnp.float32)

    out = jax.block_until_ready(model(x))
    assert out.shape == (B, D_in), out.shape

    # Bitwise-equivalent-math reference (folded BN, bf16 dots): tight tolerance.
    ref_fused = _reference_fused(model, x)
    assert jnp.allclose(out, ref_fused, atol=1e-3, rtol=1e-3), "mismatch vs fused reference"

    # Exact f32 PyTorch-semantics reference: loose tolerance (bf16 weight rounding).
    ref_exact = _reference_exact(model, x)
    assert jnp.allclose(out, ref_exact, atol=5e-2, rtol=5e-2), "mismatch vs exact reference"

    print("KERNEL_OK")
</pallas_src>

<mosaic_0001>
module attributes {stable_mosaic.version = 11 : i64} {
  func.func @kernel(%arg0: i32, %arg1: memref<8x32xf32, #tpu.memory_space<vmem>>, %arg2: memref<32x128xbf16, #tpu.memory_space<vmem>>, %arg3: memref<1x128xf32, #tpu.memory_space<vmem>>, %arg4: memref<128x128xbf16, #tpu.memory_space<vmem>>, %arg5: memref<1x128xf32, #tpu.memory_space<vmem>>, %arg6: memref<128x128xbf16, #tpu.memory_space<vmem>>, %arg7: memref<1x128xf32, #tpu.memory_space<vmem>>, %arg8: memref<8x128xf32, #tpu.memory_space<vmem>>) attributes {dimension_semantics = [#tpu.dimension_semantics<parallel>], iteration_bounds = array<i64: 1>, scalar_prefetch = 0 : i64, scratch_operands = 0 : i64, tpu.core_type = #tpu.core_type<tc>, window_params = [{transform_indices = @transform_0, window_bounds = array<i64: 8, 32>}, {pipeline_mode = #tpu.pipeline_mode<synchronous>, transform_indices = @transform_1, window_bounds = array<i64: 32, 128>}, {pipeline_mode = #tpu.pipeline_mode<synchronous>, transform_indices = @transform_2, window_bounds = array<i64: 1, 128>}, {pipeline_mode = #tpu.pipeline_mode<synchronous>, transform_indices = @transform_3, window_bounds = array<i64: 128, 128>}, {pipeline_mode = #tpu.pipeline_mode<synchronous>, transform_indices = @transform_4, window_bounds = array<i64: 1, 128>}, {pipeline_mode = #tpu.pipeline_mode<synchronous>, transform_indices = @transform_5, window_bounds = array<i64: 128, 128>}, {pipeline_mode = #tpu.pipeline_mode<synchronous>, transform_indices = @transform_6, window_bounds = array<i64: 1, 128>}, {transform_indices = @transform_7, window_bounds = array<i64: 8, 128>}]} {
    %c0 = arith.constant 0 : index
    %c0_0 = arith.constant 0 : index
    %0 = vector.load %arg1[%c0, %c0_0] : memref<8x32xf32, #tpu.memory_space<vmem>>, vector<8x32xf32>
    %1 = arith.truncf %0 : vector<8x32xf32> to vector<8x32xbf16>
    %c0_1 = arith.constant 0 : index
    %c0_2 = arith.constant 0 : index
    %2 = vector.load %arg2[%c0_1, %c0_2] : memref<32x128xbf16, #tpu.memory_space<vmem>>, vector<32x128xbf16>
    %cst = arith.constant dense<0.000000e+00> : vector<8x128xf32>
    %3 = tpu.matmul %1, %2, %cst {dimension_numbers = #tpu.dot_dimension_numbers<[1], [0], [0], [1], [0, 0, 1, 1], [], []>} : vector<8x32xbf16>, vector<32x128xbf16>, vector<8x128xf32> -> vector<8x128xf32>
    %c0_3 = arith.constant 0 : index
    %c0_4 = arith.constant 0 : index
    %4 = vector.load %arg3[%c0_3, %c0_4] : memref<1x128xf32, #tpu.memory_space<vmem>>, vector<1x128xf32>
    %5 = vector.broadcast %4 : vector<1x128xf32> to vector<8x128xf32>
    %6 = arith.addf %3, %5 : vector<8x128xf32>
    %cst_5 = arith.constant 5.000000e-01 : f32
    %7 = vector.broadcast %cst_5 : f32 to vector<8x128xf32>
    %8 = arith.mulf %7, %6 : vector<8x128xf32>
    %cst_6 = arith.constant 0.707106769 : f32
    %9 = vector.broadcast %cst_6 : f32 to vector<8x128xf32>
    %10 = arith.mulf %6, %9 : vector<8x128xf32>
    %11 = math.erf %10 : vector<8x128xf32>
    %cst_7 = arith.constant 1.000000e+00 : f32
    %12 = vector.broadcast %cst_7 : f32 to vector<8x128xf32>
    %13 = arith.addf %12, %11 : vector<8x128xf32>
    %14 = arith.mulf %8, %13 : vector<8x128xf32>
    %15 = arith.truncf %14 : vector<8x128xf32> to vector<8x128xbf16>
    %c0_8 = arith.constant 0 : index
    %c0_9 = arith.constant 0 : index
    %16 = vector.load %arg4[%c0_8, %c0_9] : memref<128x128xbf16, #tpu.memory_space<vmem>>, vector<128x128xbf16>
    %cst_10 = arith.constant dense<0.000000e+00> : vector<8x128xf32>
    %17 = tpu.matmul %15, %16, %cst_10 {dimension_numbers = #tpu.dot_dimension_numbers<[1], [0], [0], [1], [0, 0, 1, 1], [], []>} : vector<8x128xbf16>, vector<128x128xbf16>, vector<8x128xf32> -> vector<8x128xf32>
    %c0_11 = arith.constant 0 : index
    %c0_12 = arith.constant 0 : index
    %18 = vector.load %arg5[%c0_11, %c0_12] : memref<1x128xf32, #tpu.memory_space<vmem>>, vector<1x128xf32>
    %19 = vector.broadcast %18 : vector<1x128xf32> to vector<8x128xf32>
    %20 = arith.addf %17, %19 : vector<8x128xf32>
    %cst_13 = arith.constant 5.000000e-01 : f32
    %21 = vector.broadcast %cst_13 : f32 to vector<8x128xf32>
    %22 = arith.mulf %21, %20 : vector<8x128xf32>
    %cst_14 = arith.constant 0.707106769 : f32
    %23 = vector.broadcast %cst_14 : f32 to vector<8x128xf32>
    %24 = arith.mulf %20, %23 : vector<8x128xf32>
    %25 = math.erf %24 : vector<8x128xf32>
    %cst_15 = arith.constant 1.000000e+00 : f32
    %26 = vector.broadcast %cst_15 : f32 to vector<8x128xf32>
    %27 = arith.addf %26, %25 : vector<8x128xf32>
    %28 = arith.mulf %22, %27 : vector<8x128xf32>
    %29 = arith.truncf %28 : vector<8x128xf32> to vector<8x128xbf16>
    %c0_16 = arith.constant 0 : index
    %c0_17 = arith.constant 0 : index
    %30 = vector.load %arg6[%c0_16, %c0_17] : memref<128x128xbf16, #tpu.memory_space<vmem>>, vector<128x128xbf16>
    %cst_18 = arith.constant dense<0.000000e+00> : vector<8x128xf32>
    %31 = tpu.matmul %29, %30, %cst_18 {dimension_numbers = #tpu.dot_dimension_numbers<[1], [0], [0], [1], [0, 0, 1, 1], [], []>} : vector<8x128xbf16>, vector<128x128xbf16>, vector<8x128xf32> -> vector<8x128xf32>
    %c0_19 = arith.constant 0 : index
    %c0_20 = arith.constant 0 : index
    %32 = vector.load %arg7[%c0_19, %c0_20] : memref<1x128xf32, #tpu.memory_space<vmem>>, vector<1x128xf32>
    %33 = vector.broadcast %32 : vector<1x128xf32> to vector<8x128xf32>
    %34 = arith.addf %31, %33 : vector<8x128xf32>
    %c0_21 = arith.constant 0 : index
    %c0_22 = arith.constant 0 : index
    %35 = vector.load %arg8[%c0_21, %c0_22] : memref<8x128xf32, #tpu.memory_space<vmem>>, vector<8x128xf32>
    tpu.vector_store %arg8[%c0_21, %c0_22], %34 {strides = array<i32>} : memref<8x128xf32, #tpu.memory_space<vmem>>, vector<8x128xf32>,
    return
  }
  func.func @transform_0(%arg0: i32) -> (i32, i32) {
    %c0_i32 = arith.constant 0 : i32
    %c0_i32_0 = arith.constant 0 : i32
    return %arg0, %c0_i32 : i32, i32
  }
  func.func @transform_1(%arg0: i32) -> (i32, i32) {
    %c0_i32 = arith.constant 0 : i32
    %c0_i32_0 = arith.constant 0 : i32
    %c0_i32_1 = arith.constant 0 : i32
    return %c0_i32, %c0_i32_0 : i32, i32
  }
  func.func @transform_2(%arg0: i32) -> (i32, i32) {
    %c0_i32 = arith.constant 0 : i32
    %c0_i32_0 = arith.constant 0 : i32
    %c0_i32_1 = arith.constant 0 : i32
    return %c0_i32, %c0_i32_0 : i32, i32
  }
  func.func @transform_3(%arg0: i32) -> (i32, i32) {
    %c0_i32 = arith.constant 0 : i32
    %c0_i32_0 = arith.constant 0 : i32
    %c0_i32_1 = arith.constant 0 : i32
    return %c0_i32, %c0_i32_0 : i32, i32
  }
  func.func @transform_4(%arg0: i32) -> (i32, i32) {
    %c0_i32 = arith.constant 0 : i32
    %c0_i32_0 = arith.constant 0 : i32
    %c0_i32_1 = arith.constant 0 : i32
    return %c0_i32, %c0_i32_0 : i32, i32
  }
  func.func @transform_5(%arg0: i32) -> (i32, i32) {
    %c0_i32 = arith.constant 0 : i32
    %c0_i32_0 = arith.constant 0 : i32
    %c0_i32_1 = arith.constant 0 : i32
    return %c0_i32, %c0_i32_0 : i32, i32
  }
  func.func @transform_6(%arg0: i32) -> (i32, i32) {
    %c0_i32 = arith.constant 0 : i32
    %c0_i32_0 = arith.constant 0 : i32
    %c0_i32_1 = arith.constant 0 : i32
    return %c0_i32, %c0_i32_0 : i32, i32
  }
  func.func @transform_7(%arg0: i32) -> (i32, i32) {
    %c0_i32 = arith.constant 0 : i32
    %c0_i32_0 = arith.constant 0 : i32
    return %arg0, %c0_i32 : i32, i32
  }
}

</mosaic_0001>

<bundles_post_ra>
// kernel: tpu_custom_call.1
= control target key start
LH: loop header
LB: loop body
LE: loop exit
PB: predicated region body
PF: predicated region fallthrough
CT: control target
= control target key end

     0   :  { %12 = vsyncpa [#allocation3], 0  ;;  %s706_s0 = inlined_call_operand.hbm [shape: f32[8,32], index: 0, kind: input, shape index: {}]   ;;  %s707_s1 = inlined_call_operand.hbm [shape: bf16[32,128], index: 1, kind: input, shape index: {}]   ;;  %s708_s2 = inlined_call_operand.vmem [shape: f32[1,128], index: 2, kind: input, shape index: {}]   ;;  %s709_s3 = inlined_call_operand.hbm [shape: bf16[128,128], index: 3, kind: input, shape index: {}]   ;;  %s710_s4 = inlined_call_operand.vmem [shape: f32[1,128], index: 4, kind: input, shape index: {}]   ;;  %s711_s5 = inlined_call_operand.hbm [shape: bf16[128,128], index: 5, kind: input, shape index: {}]   ;;  %s712_s6 = inlined_call_operand.vmem [shape: f32[1,128], index: 6, kind: input, shape index: {}]   ;;  %s713_s7 = inlined_call_operand.hbm [shape: f32[8,128], index: 7, kind: output, shape index: {}]  }
   0x1   :  { %13 = vsyncpa [#allocation6], 0 }
   0x2   :  { %14 = vsyncpa [#allocation9], 0  ;;  %s31_s26 = sshll.u32 %s707_s1, 4  ;;  %s32_s26 = int_to_ptr.hbm [resolvable:$true] %s31_s26 }
   0x3   :  { %15 = vsyncpa [#allocation4], 0  ;;  %s635_s27 = smov [#allocation5]   ;;  %s21_s8 = sshll.u32 %s706_s0, 4  ;;  %s22_s8 = int_to_ptr.hbm [resolvable:$true] %s21_s8 }
   0x4   :  { %s33_s28 = sshll.u32 %s635_s27, 4  ;;  %s636_s9 = smov 64   ;;  %s34_s28 = int_to_ptr.vmem [resolvable:$true] %s33_s28 }
   0x5   :  { %s637_s10 = smov 4   ;;  %s638_s11 = smov [#allocation2]  }
   0x6   :  { %39 = dma.hbm_to_vmem [thread:$0]  %s32_s26, 256, %s34_s28, [#allocation6], %s636_s9, %s636_s9, %s637_s10  }
   0x7   :  { %s23_s12 = sshll.u32 %s638_s11, 4  ;;  %s46_s15 = sshll.u32 %s709_s3, 4  ;;  %s24_s12 = int_to_ptr.vmem [resolvable:$true] %s23_s12  ;;  %s47_s15 = int_to_ptr.hbm [resolvable:$true] %s46_s15 }
   0x8   :  { %26 = dma.hbm_to_vmem [thread:$0]  %s22_s8, 128, %s24_s12, [#allocation3]  }
   0x9   :  { %s61_s17 = sshll.u32 %s711_s5, 4  ;;  %s639_s18 = smov [#allocation7]   ;;  %s62_s17 = int_to_ptr.hbm [resolvable:$true] %s61_s17 }
   0xa   :  { %s48_s19 = sshll.u32 %s639_s18, 4  ;;  %s640_s0 = smov [#allocation8]   ;;  %s49_s19 = int_to_ptr.vmem [resolvable:$true] %s48_s19 }
   0xb   :  { %54 = dma.hbm_to_vmem [thread:$0]  %s47_s15, 1024, %s49_s19, [#allocation6], %s636_s9, %s636_s9, %s637_s10  }
   0xc   :  { %s63_s20 = sshll.u32 %s640_s0, 4  ;;  %s64_s20 = int_to_ptr.vmem [resolvable:$true] %s63_s20 }
   0xd   :  { %69 = dma.hbm_to_vmem [thread:$0]  %s62_s17, 1024, %s64_s20, [#allocation9], %s636_s9, %s636_s9, %s637_s10  }
   0xe   :  { %627 = dma.done.wait [#allocation3], 128  }
   0xf   :  { %628 = vsyncadd [#allocation3], 4294967168 }
  0x10   :  { %629 = dma.done.wait [#allocation6], 1280  }
  0x11   :  { %630 = vsyncadd [#allocation6], 4294966016 }
  0x12   :  { %631 = dma.done.wait [#allocation9], 1024  }
  0x13   :  { %632 = vsyncadd [#allocation9], 4294966272  ;;  %v476_v0 = vld [vmem:[#allocation5 + $0x8] sm:$0xff]  ;;  %v475_v1 = vld [vmem:[#allocation5] sm:$0xff]  ;;  %vm111_vm0 = vcmask 261120   ;;  %s641_s23 = smov [#allocation10]  }
  0x14   :  { %121 = vmatpush.bf16.msra.mxu0 %v476_v0  ;;  %v89_v2 = vld [vmem:[#allocation2] sm:$0xff]  ;;  %v484_v4 = vld [vmem:[#allocation7 + $0x38] sm:$0xff]  ;;  %v483_v5 = vld [vmem:[#allocation7 + $0x30] sm:$0xff]  ;;  %s386_s24 = sshll.u32 %s641_s23, 4  ;;  %s388_s27 = sshll.u32 %s713_s7, 4  ;;  %s387_s24 = int_to_ptr.vmem [resolvable:$true] %s386_s24  ;;  %s389_s27 = int_to_ptr.hbm [resolvable:$true] %s388_s27 }
  0x15   :  { %v90_v3 = vpack.c.bf16 %v89_v2, %v89_v2  ;;  %241 = vmatpush.bf16.msra.mxu1 %v484_v4  ;;  %v500_v6 = vld [vmem:[%s708_s2] ss:$0 sm:$0xff]  ;;  %v481_v10 = vld [vmem:[#allocation7 + $0x20] sm:$0xff]  ;;  %v480_v13 = vld [vmem:[#allocation7 + $0x18] sm:$0xff] }
  0x16   :  { %v482_v7 = vld [vmem:[#allocation7 + $0x28] sm:$0xff]  ;;  %v479_v17 = vld [vmem:[#allocation7 + $0x10] sm:$0xff]  ;;  %v477_v26 = vld [vmem:[#allocation7] sm:$0xff] }
  0x17   :  { %v478_v22 = vld [vmem:[#allocation7 + $0x8] sm:$0xff]  ;;  %v492_v56 = vld [vmem:[#allocation8 + $0x38] sm:$0xff]  ;;  %v491_v57 = vld [vmem:[#allocation8 + $0x30] sm:$0xff] }
  0x18   :  { %122 = vmatpush.bf16.msra.mxu0 %v475_v1  ;;  %367 = vmatpush.bf16.msra.mxu2 %v492_v56  ;;  %v501_v58 = vld [vmem:[%s710_s4] ss:$0 sm:$0xff]  ;;  %v489_v62 = vld [vmem:[#allocation8 + $0x20] sm:$0xff]  ;;  %v488_v1 = vld [vmem:[#allocation8 + $0x18] sm:$0xff] }
  0x19   :  { %242 = vmatpush.bf16.msra.mxu1 %v483_v5  ;;  %v490_v59 = vld [vmem:[#allocation8 + $0x28] sm:$0xff] }
  0x1b   :  { %408 = vmatmul.msk.bf16.vlgmr.msra.gmra.mxu0 %vm111_vm0, %v90_v3 }
  0x1c   :  { %368 = vmatpush.bf16.msra.mxu2 %v491_v57 }
  0x1d   :  { %243 = vmatpush.bf16.msra.mxu1 %v482_v7 }
  0x20   :  { %369 = vmatpush.bf16.msra.mxu2 %v490_v59 }
  0x21   :  { %244 = vmatpush.bf16.msra.mxu1 %v481_v10 }
  0x24   :  { %370 = vmatpush.bf16.msra.mxu2 %v489_v62 }
  0x25   :  { %245 = vmatpush.bf16.msra.mxu1 %v480_v13 }
  0x28   :  { %371 = vmatpush.bf16.msra.mxu2 %v488_v1 }
  0x29   :  { %246 = vmatpush.bf16.msra.mxu1 %v479_v17 }
  0x2d   :  { %247 = vmatpush.bf16.msra.mxu1 %v478_v22 }
  0x31   :  { %248 = vmatpush.bf16.msra.mxu1 %v477_v26 }
  0x98   :  { %v124_v8 = vpop.f32.mrf.mxu0 }
  0x99   :  { %v125_v9 = vadd.f32 %v500_v6, %v124_v8  ;;  %v487_v6 = vld [vmem:[#allocation8 + $0x10] sm:$0xff] }
  0x9a   :  { %372 = vmatpush.bf16.msra.mxu2 %v487_v6 }
  0x9b   :  { %v129_v11 = vmul.f32 0.70710677, %v125_v9  ;;  %v128_v52 = vmul.f32 0.5, %v125_v9 }
  0x9d   :  { %v130_v12 = vmul.f32 %v129_v11, %v129_v11 }
  0x9f   :  { %v131_v14 = vmin.f32 %v130_v12, 16.0 }
  0xa0   :  { %v126_v15 = vpop.f32.mrf.mxu0 }
  0xa1   :  { %v132_v16 = vmul.f32 2.1237322e-06, %v131_v14  ;;  %v143_v18 = vmul.f32 3.8918573e-05, %v131_v14  ;;  %v485_v15 = vld [vmem:[#allocation8] sm:$0xff] }
  0xa3   :  { %v133_v19 = vadd.f32 0.00028619796, %v132_v16  ;;  %v144_v20 = vadd.f32 0.001143296, %v143_v18 }
  0xa5   :  { %v134_v21 = vmul.f32 %v133_v19, %v131_v14  ;;  %v145_v23 = vmul.f32 %v144_v20, %v131_v14 }
  0xa7   :  { %v146_v24 = vadd.f32 0.014752088, %v145_v23  ;;  %v135_v25 = vadd.f32 0.0036580483, %v134_v21 }
  0xa9   :  { %v147_v27 = vmul.f32 %v146_v24, %v131_v14  ;;  %v136_v29 = vmul.f32 %v135_v25, %v131_v14 }
  0xab   :  { %v148_v28 = vadd.f32 0.112945676, %v147_v27  ;;  %v137_v32 = vadd.f32 0.05243302, %v136_v29 }
  0xad   :  { %v149_v30 = vmul.f32 %v148_v28, %v131_v14  ;;  %v138_v35 = vmul.f32 %v137_v32, %v131_v14 }
  0xaf   :  { %v150_v31 = vadd.f32 0.4994258, %v149_v30  ;;  %v139_v36 = vadd.f32 0.18741608, %v138_v35 }
  0xb1   :  { %v151_v33 = vmul.f32 %v150_v31, %v131_v14  ;;  %v140_v38 = vmul.f32 %v139_v36, %v131_v14 }
  0xb3   :  { %v152_v34 = vadd.f32 1.0, %v151_v33  ;;  %v141_v42 = vadd.f32 1.1283791, %v140_v38 }
  0xb5   :  { %503 = vrcp.f32 %v152_v34  ;;  %v164_v41 = vand.u32 2147483648, %v152_v34  ;;  %v162_v44 = vand.u32 2147483647, %v152_v34  ;;  %vm158_vm2 = vweird.f32 %v152_v34 }
  0xb6   :  { %v142_v47 = vmul.f32 %v141_v42, %v129_v11  ;;  %v486_v11 = vld [vmem:[#allocation8 + $0x8] sm:$0xff] }
  0xb7   :  { %v165_v46 = vor.u32 1.1754944e-38, %v164_v41  ;;  %vm163_vm4 = vcmp.eq.f32.partialorder %v162_v44, 8.507059e+37  ;;  %373 = vmatpush.bf16.msra.mxu2 %v486_v11  ;;  %v502_v44 = vld [vmem:[%s712_s6] ss:$0 sm:$0xff] }
  0xbb   :  { %v504_v37 = vpop.eup %503  ;;  %374 = vmatpush.bf16.msra.mxu2 %v485_v15 }
  0xbc   :  { %v154_v39 = vmul.f32 %v504_v37, %v152_v34  ;;  %vm159_vm1 = vweird.f32 %v504_v37 }
  0xbd   :  { %vm160_vm3 = vmor %vm158_vm2, %vm159_vm1 }
  0xbe   :  { %v155_v40 = vsub.f32 1.0, %v154_v39 }
  0xc0   :  { %v156_v43 = vmul.f32 %v504_v37, %v155_v40 }
  0xc2   :  { %v157_v45 = vadd.f32 %v504_v37, %v156_v43 }
  0xc4   :  { %v161_v48 = vsel %vm160_vm3, %v504_v37, %v157_v45 }
  0xc5   :  { %v166_v49 = vsel %vm163_vm4, %v165_v46, %v161_v48 }
  0xc6   :  { %v167_v50 = vmul.f32 %v166_v49, %v142_v47 }
  0xc8   :  { %v409_v51 = vclamps-f32 %v167_v50, 1.0 }
  0xca   :  { %v170_v53 = vadd.f32 1.0, %v409_v51 }
  0xcc   :  { %v171_v54 = vmul.f32 %v170_v53, %v128_v52 }
  0xce   :  { %v172_v55 = vpack.c.bf16 %v171_v54, %v171_v54 }
  0xd0   :  { %249 = vmatmul.bf16.vlgmr.msra.gmra.mxu1 %v172_v55 }
 0x14d   :  { %v250_v60 = vpop.f32.mrf.mxu1 }
 0x14e   :  { %v251_v61 = vadd.f32 %v501_v58, %v250_v60 }
 0x150   :  { %v255_v63 = vmul.f32 0.70710677, %v251_v61  ;;  %v254_v40 = vmul.f32 0.5, %v251_v61 }
 0x152   :  { %v256_v0 = vmul.f32 %v255_v63, %v255_v63 }
 0x154   :  { %v257_v2 = vmin.f32 %v256_v0, 16.0 }
 0x155   :  { %v252_v3 = vpop.f32.mrf.mxu1 }
 0x156   :  { %v258_v4 = vmul.f32 2.1237322e-06, %v257_v2  ;;  %v269_v5 = vmul.f32 3.8918573e-05, %v257_v2 }
 0x158   :  { %v259_v7 = vadd.f32 0.00028619796, %v258_v4  ;;  %v270_v8 = vadd.f32 0.001143296, %v269_v5 }
 0x15a   :  { %v260_v9 = vmul.f32 %v259_v7, %v257_v2  ;;  %v271_v10 = vmul.f32 %v270_v8, %v257_v2 }
 0x15c   :  { %v272_v12 = vadd.f32 0.014752088, %v271_v10  ;;  %v261_v13 = vadd.f32 0.0036580483, %v260_v9 }
 0x15e   :  { %v273_v14 = vmul.f32 %v272_v12, %v257_v2  ;;  %v262_v17 = vmul.f32 %v261_v13, %v257_v2 }
 0x160   :  { %v274_v16 = vadd.f32 0.112945676, %v273_v14  ;;  %v263_v20 = vadd.f32 0.05243302, %v262_v17 }
 0x162   :  { %v275_v18 = vmul.f32 %v274_v16, %v257_v2  ;;  %v264_v23 = vmul.f32 %v263_v20, %v257_v2 }
 0x164   :  { %v276_v19 = vadd.f32 0.4994258, %v275_v18  ;;  %v265_v24 = vadd.f32 0.18741608, %v264_v23 }
 0x166   :  { %v277_v21 = vmul.f32 %v276_v19, %v257_v2  ;;  %v266_v26 = vmul.f32 %v265_v24, %v257_v2 }
 0x168   :  { %v278_v22 = vadd.f32 1.0, %v277_v21  ;;  %v267_v30 = vadd.f32 1.1283791, %v266_v26 }
 0x16a   :  { %505 = vrcp.f32 %v278_v22  ;;  %v290_v29 = vand.u32 2147483648, %v278_v22  ;;  %v288_v32 = vand.u32 2147483647, %v278_v22  ;;  %vm284_vm6 = vweird.f32 %v278_v22 }
 0x16b   :  { %v268_v35 = vmul.f32 %v267_v30, %v255_v63 }
 0x16c   :  { %v291_v34 = vor.u32 1.1754944e-38, %v290_v29  ;;  %vm289_vm8 = vcmp.eq.f32.partialorder %v288_v32, 8.507059e+37 }
 0x170   :  { %v506_v25 = vpop.eup %505 }
 0x171   :  { %v280_v27 = vmul.f32 %v506_v25, %v278_v22  ;;  %vm285_vm5 = vweird.f32 %v506_v25 }
 0x172   :  { %vm286_vm7 = vmor %vm284_vm6, %vm285_vm5 }
 0x173   :  { %v281_v28 = vsub.f32 1.0, %v280_v27 }
 0x175   :  { %v282_v31 = vmul.f32 %v506_v25, %v281_v28 }
 0x177   :  { %v283_v33 = vadd.f32 %v506_v25, %v282_v31 }
 0x179   :  { %v287_v36 = vsel %vm286_vm7, %v506_v25, %v283_v33 }
 0x17a   :  { %v292_v37 = vsel %vm289_vm8, %v291_v34, %v287_v36 }
 0x17b   :  { %v293_v38 = vmul.f32 %v292_v37, %v268_v35 }
 0x17d   :  { %v442_v39 = vclamps-f32 %v293_v38, 1.0 }
 0x17f   :  { %v296_v41 = vadd.f32 1.0, %v442_v39 }
 0x181   :  { %v297_v42 = vmul.f32 %v296_v41, %v254_v40 }
 0x183   :  { %v298_v43 = vpack.c.bf16 %v297_v42, %v297_v42 }
 0x185   :  { %375 = vmatmul.bf16.vlgmr.msra.gmra.mxu2 %v298_v43 }
 0x208   :  { %v376_v45 = vpop.f32.mrf.mxu2 }
 0x209   :  { %v377_v46 = vadd.f32 %v502_v44, %v376_v45 }
 0x20b   :  { %380 = vst [vmem:[#allocation10] sm:$0xff] %v377_v46 }
 0x20c   :  { %391 = dma.vmem_to_hbm [thread:$0]  %s387_s24, 128, %s389_s27, [#allocation4]  }
 0x210   :  { %v378_v47 = vpop.f32.mrf.mxu2 }
 0x211   :  { %633 = dma.done.wait [#allocation4], 128  }
 0x212   :  { %634 = vsyncadd [#allocation4], 4294967168 }
 0x213   :  { %396 = vsyncpa [#allocation3], 1 }
 0x214   :  { %397 = vsyncpa [#allocation6], 1 }
 0x215   :  { %398 = vsyncpa [#allocation9], 1 }
 0x216   :  { %399 = vsyncpa [#allocation4], 1 }

</bundles_post_ra>
